<compile_context>
chip_gen: v7x
topology: tpu7x:2x2x1
jax: 0.10.0
libtpu: 0.0.40
codegen_flags: <defaults>
</compile_context>

<pallas_src>
import jax
import jax.numpy as jnp
import numpy as np
from jax.experimental import pallas as pl
from jax.experimental.pallas import tpu as pltpu


def _round_up(x, m):
    return ((x + m - 1) // m) * m


# ------------------------------------------------------------------ kernels --

def _conv_bias_relu_pool_kernel(p_ref, w_ref, b_ref, o_ref):
    """4 quadrant matmuls -> elementwise max (2x2 maxpool) -> +bias -> ReLU.

    p_ref: (4, TILE_M, Kp) bf16   im2col patches, one slab per pool quadrant
    w_ref: (Kp, Cp)        bf16   conv weight as a matmul matrix
    b_ref: (1, Cp)         f32    conv bias (padded channels are zero)
    o_ref: (TILE_M, Cp)    f32    pooled, activated output
    """
    w = w_ref[...]
    acc = jnp.dot(p_ref[0], w, preferred_element_type=jnp.float32)
    for q in range(1, 4):
        acc = jnp.maximum(
            acc, jnp.dot(p_ref[q], w, preferred_element_type=jnp.float32))
    o_ref[...] = jnp.maximum(acc + b_ref[...], 0.0)


def _mlp_kernel(x_ref, w1_ref, b1_ref, w2_ref, b2_ref, o_ref):
    """Fused fc1 + ReLU + fc2; the hidden layer never leaves VMEM."""
    h = jnp.dot(x_ref[...], w1_ref[...], preferred_element_type=jnp.float32)
    h = jnp.maximum(h + b1_ref[...], 0.0)
    o = jnp.dot(h.astype(jnp.bfloat16), w2_ref[...],
                preferred_element_type=jnp.float32)
    o_ref[...] = o + b2_ref[...]


# ----------------------------------------------------------------- wrappers --

def conv_bias_relu_pool(patches_q, w_mat, bias, *, tile_m=256):
    """patches_q: (4, Mp, K) f32 ; w_mat: (K, C) ; bias: (C,) -> (Mp, C) f32."""
    _, mp, k = patches_q.shape
    c = w_mat.shape[1]
    kp = _round_up(k, 128)
    cp = _round_up(c, 128)
    tile_m = min(tile_m, _round_up(mp, 8))
    mpad = _round_up(mp, tile_m)

    pq = jnp.pad(patches_q, ((0, 0), (0, mpad - mp), (0, kp - k))
                 ).astype(jnp.bfloat16)
    wp = jnp.pad(w_mat, ((0, kp - k), (0, cp - c))).astype(jnp.bfloat16)
    bp = jnp.pad(bias.reshape(1, -1), ((0, 0), (0, cp - c))).astype(jnp.float32)

    out = pl.pallas_call(
        _conv_bias_relu_pool_kernel,
        out_shape=jax.ShapeDtypeStruct((mpad, cp), jnp.float32),
        grid_spec=pltpu.PrefetchScalarGridSpec(
            num_scalar_prefetch=0,
            grid=(mpad // tile_m,),
            in_specs=[
                pl.BlockSpec((4, tile_m, kp), lambda i: (0, i, 0)),
                pl.BlockSpec((kp, cp), lambda i: (0, 0)),
                pl.BlockSpec((1, cp), lambda i: (0, 0)),
            ],
            out_specs=pl.BlockSpec((tile_m, cp), lambda i: (i, 0)),
        ),
        compiler_params=pltpu.CompilerParams(
            dimension_semantics=("parallel",)),
    )(pq, wp, bp)
    return out[:mp, :c]


def mlp(x, w1, b1, w2, b2):
    """x: (N, K1); w1: (K1, H1); w2: (H1, C2).  Returns (N, C2) f32."""
    n, k1 = x.shape
    h1 = w1.shape[1]
    c2 = w2.shape[1]
    k1p = _round_up(k1, 128)
    h1p = _round_up(h1, 128)
    c2p = _round_up(c2, 128)

    xq = jnp.pad(x, ((0, 0), (0, k1p - k1))).astype(jnp.bfloat16)
    w1p = jnp.pad(w1, ((0, k1p - k1), (0, h1p - h1))).astype(jnp.bfloat16)
    b1p = jnp.pad(b1.reshape(1, -1), ((0, 0), (0, h1p - h1))).astype(jnp.float32)
    w2p = jnp.pad(w2, ((0, h1p - h1), (0, c2p - c2))).astype(jnp.bfloat16)
    b2p = jnp.pad(b2.reshape(1, -1), ((0, 0), (0, c2p - c2))).astype(jnp.float32)

    out = pl.pallas_call(
        _mlp_kernel,
        out_shape=jax.ShapeDtypeStruct((n, c2p), jnp.float32),
        in_specs=[
            pl.BlockSpec((n, k1p), lambda: (0, 0)),
            pl.BlockSpec((k1p, h1p), lambda: (0, 0)),
            pl.BlockSpec((1, h1p), lambda: (0, 0)),
            pl.BlockSpec((h1p, c2p), lambda: (0, 0)),
            pl.BlockSpec((1, c2p), lambda: (0, 0)),
        ],
        out_specs=pl.BlockSpec((n, c2p), lambda: (0, 0)),
    )(xq, w1p, b1p, w2p, b2p)
    return out[:, :c2]


# --------------------------------------------------------------------- glue --

def im2col(x_nhwc, ksize, stride, padding):
    """(N,H,W,C) -> (N,Ho,Wo, k*k*C) patches, kh-major / kw / channel order."""
    n, h, w, c = x_nhwc.shape
    xp = jnp.pad(x_nhwc, ((0, 0), (padding, padding), (padding, padding), (0, 0)))
    ho = (h + 2 * padding - ksize) // stride + 1
    wo = (w + 2 * padding - ksize) // stride + 1
    cols = []
    for kh in range(ksize):
        for kw in range(ksize):
            cols.append(
                xp[:, kh:kh + stride * ho:stride, kw:kw + stride * wo:stride, :])
    return jnp.concatenate(cols, axis=-1), ho, wo


def quadrant_stack(patches_nhwk):
    """Split conv-output patch rows into the 4 quadrants of a 2x2 maxpool."""
    n, ho, wo, k = patches_nhwk.shape
    hp, wp = ho // 2, wo // 2
    qs = []
    for dh in range(2):
        for dw in range(2):
            qs.append(patches_nhwk[:, dh::2, dw::2, :].reshape(n * hp * wp, k))
    return jnp.stack(qs, axis=0), hp, wp   # (4, N*Hp*Wp, K)


def w_oihw_to_mat(w_oihw):
    """PyTorch (O,I,kH,kW) -> (kH*kW*I, O) matching the im2col column order."""
    o, i, kh, kw = w_oihw.shape
    return jnp.transpose(w_oihw, (2, 3, 1, 0)).reshape(kh * kw * i, o)


def fc1_w_to_nhwc_mat(w, c, h, wd):
    """PyTorch fc1 weight (O, C*H*W) (NCHW flatten) -> (H*W*C, O) for NHWC."""
    o = w.shape[0]
    return jnp.transpose(w.reshape(o, c, h, wd), (2, 3, 1, 0)).reshape(h * wd * c, o)


def cnn_forward(x_nchw, params):
    """Pallas implementation of CNN.forward."""
    n = x_nchw.shape[0]
    x = jnp.transpose(x_nchw, (0, 2, 3, 1)).astype(jnp.float32)   # NHWC

    # conv1 (5x5, pad 2) + bias + ReLU + maxpool 2x2  (single fused kernel)
    # TODO(synk): at real sizes, build the im2col patches inside the kernel
    # from a VMEM-resident activation tile instead of materializing them in HBM.
    p1, ho1, wo1 = im2col(x, 5, 1, 2)
    q1, hp1, wp1 = quadrant_stack(p1)
    y1 = conv_bias_relu_pool(q1, w_oihw_to_mat(params["conv1_w"]),
                             params["conv1_b"])
    c1 = params["conv1_w"].shape[0]
    y1 = y1.reshape(n, hp1, wp1, c1)

    # conv2 (5x5, pad 2) + bias + ReLU + maxpool 2x2
    p2, ho2, wo2 = im2col(y1, 5, 1, 2)
    q2, hp2, wp2 = quadrant_stack(p2)
    y2 = conv_bias_relu_pool(q2, w_oihw_to_mat(params["conv2_w"]),
                             params["conv2_b"])
    c2 = params["conv2_w"].shape[0]
    y2 = y2.reshape(n, hp2, wp2, c2)

    # flatten (NHWC) + fc1 + ReLU + fc2 (fused); fc1 weight re-ordered so the
    # result matches PyTorch's NCHW x.view(N, -1) flatten.
    feat = y2.reshape(n, hp2 * wp2 * c2)
    w1 = fc1_w_to_nhwc_mat(params["fc1_w"], c2, hp2, wp2)
    return mlp(feat, w1, params["fc1_b"],
               params["fc2_w"].T, params["fc2_b"])


# ------------------------------------------------------------ JAX reference --

def _maxpool2x2_nchw(y):
    n, c, h, w = y.shape
    return y.reshape(n, c, h // 2, 2, w // 2, 2).max(axis=(3, 5))


def _q(t):
    # mirror the kernel's bf16 MXU operands (f32 accumulation)
    return t.astype(jnp.bfloat16).astype(jnp.float32)


def cnn_reference(x, params):
    hi = jax.lax.Precision.HIGHEST
    y = jax.lax.conv_general_dilated(
        _q(x), _q(params["conv1_w"]), (1, 1), ((2, 2), (2, 2)),
        dimension_numbers=("NCHW", "OIHW", "NCHW"), precision=hi)
    y = y + params["conv1_b"].reshape(1, -1, 1, 1)
    y = _maxpool2x2_nchw(jax.nn.relu(y))
    y = jax.lax.conv_general_dilated(
        _q(y), _q(params["conv2_w"]), (1, 1), ((2, 2), (2, 2)),
        dimension_numbers=("NCHW", "OIHW", "NCHW"), precision=hi)
    y = y + params["conv2_b"].reshape(1, -1, 1, 1)
    y = _maxpool2x2_nchw(jax.nn.relu(y))
    feat = y.reshape(y.shape[0], -1)                 # NCHW flatten (PyTorch)
    h = jax.nn.relu(jnp.dot(_q(feat), _q(params["fc1_w"].T), precision=hi)
                    + params["fc1_b"])
    return jnp.dot(_q(h), _q(params["fc2_w"].T), precision=hi) + params["fc2_b"]


# --------------------------------------------------------------------- main --

if __name__ == "__main__":
    num_classes = 10
    N, C_in, H, W = 2, 3, 32, 32     # 32x32 input -> fc1 expects 32*8*8

    key = jax.random.PRNGKey(0)
    ks = jax.random.split(key, 9)

    params = {
        "conv1_w": 0.1 * jax.random.normal(ks[0], (16, 3, 5, 5), jnp.float32),
        "conv1_b": 0.1 * jax.random.normal(ks[1], (16,), jnp.float32),
        "conv2_w": 0.05 * jax.random.normal(ks[2], (32, 16, 5, 5), jnp.float32),
        "conv2_b": 0.1 * jax.random.normal(ks[3], (32,), jnp.float32),
        "fc1_w": 0.02 * jax.random.normal(ks[4], (120, 32 * 8 * 8), jnp.float32),
        "fc1_b": 0.1 * jax.random.normal(ks[5], (120,), jnp.float32),
        "fc2_w": 0.1 * jax.random.normal(ks[6], (num_classes, 120), jnp.float32),
        "fc2_b": 0.1 * jax.random.normal(ks[7], (num_classes,), jnp.float32),
    }

    x = jax.random.normal(ks[8], (N, C_in, H, W), jnp.float32)   # NCHW input

    out = jax.block_until_ready(cnn_forward(x, params))
    ref = jax.block_until_ready(cnn_reference(x, params))

    assert out.shape == (N, num_classes)
    np.testing.assert_allclose(np.asarray(out), np.asarray(ref),
                               atol=2e-2, rtol=2e-2)

    print("KERNEL_OK")
</pallas_src>

<mosaic_0001>
module attributes {stable_mosaic.version = 11 : i64} {
  func.func @_conv_bias_relu_pool_kernel(%arg0: i32, %arg1: memref<4x256x128xbf16, #tpu.memory_space<vmem>>, %arg2: memref<128x128xbf16, #tpu.memory_space<vmem>>, %arg3: memref<1x128xf32, #tpu.memory_space<vmem>>, %arg4: memref<256x128xf32, #tpu.memory_space<vmem>>) attributes {dimension_semantics = [#tpu.dimension_semantics<parallel>], iteration_bounds = array<i64: 2>, scalar_prefetch = 0 : i64, scratch_operands = 0 : i64, tpu.core_type = #tpu.core_type<tc>, window_params = [{transform_indices = @transform_0, window_bounds = array<i64: 4, 256, 128>}, {pipeline_mode = #tpu.pipeline_mode<synchronous>, transform_indices = @transform_1, window_bounds = array<i64: 128, 128>}, {pipeline_mode = #tpu.pipeline_mode<synchronous>, transform_indices = @transform_2, window_bounds = array<i64: 1, 128>}, {transform_indices = @transform_3, window_bounds = array<i64: 256, 128>}]} {
    %c0 = arith.constant 0 : index
    %c0_0 = arith.constant 0 : index
    %0 = vector.load %arg2[%c0, %c0_0] : memref<128x128xbf16, #tpu.memory_space<vmem>>, vector<128x128xbf16>
    %c0_1 = arith.constant 0 : index
    %c0_2 = arith.constant 0 : index
    %c0_3 = arith.constant 0 : index
    %1 = vector.load %arg1[%c0_1, %c0_2, %c0_3] : memref<4x256x128xbf16, #tpu.memory_space<vmem>>, vector<1x256x128xbf16>
    %2 = vector.shape_cast %1 : vector<1x256x128xbf16> to vector<256x128xbf16>
    %cst = arith.constant dense<0.000000e+00> : vector<256x128xf32>
    %3 = tpu.matmul %2, %0, %cst {dimension_numbers = #tpu.dot_dimension_numbers<[1], [0], [0], [1], [0, 0, 1, 1], [], []>} : vector<256x128xbf16>, vector<128x128xbf16>, vector<256x128xf32> -> vector<256x128xf32>
    %c1 = arith.constant 1 : index
    %c0_4 = arith.constant 0 : index
    %c0_5 = arith.constant 0 : index
    %4 = vector.load %arg1[%c1, %c0_4, %c0_5] : memref<4x256x128xbf16, #tpu.memory_space<vmem>>, vector<1x256x128xbf16>
    %5 = vector.shape_cast %4 : vector<1x256x128xbf16> to vector<256x128xbf16>
    %cst_6 = arith.constant dense<0.000000e+00> : vector<256x128xf32>
    %6 = tpu.matmul %5, %0, %cst_6 {dimension_numbers = #tpu.dot_dimension_numbers<[1], [0], [0], [1], [0, 0, 1, 1], [], []>} : vector<256x128xbf16>, vector<128x128xbf16>, vector<256x128xf32> -> vector<256x128xf32>
    %7 = arith.maximumf %3, %6 : vector<256x128xf32>
    %c2 = arith.constant 2 : index
    %c0_7 = arith.constant 0 : index
    %c0_8 = arith.constant 0 : index
    %8 = vector.load %arg1[%c2, %c0_7, %c0_8] : memref<4x256x128xbf16, #tpu.memory_space<vmem>>, vector<1x256x128xbf16>
    %9 = vector.shape_cast %8 : vector<1x256x128xbf16> to vector<256x128xbf16>
    %cst_9 = arith.constant dense<0.000000e+00> : vector<256x128xf32>
    %10 = tpu.matmul %9, %0, %cst_9 {dimension_numbers = #tpu.dot_dimension_numbers<[1], [0], [0], [1], [0, 0, 1, 1], [], []>} : vector<256x128xbf16>, vector<128x128xbf16>, vector<256x128xf32> -> vector<256x128xf32>
    %11 = arith.maximumf %7, %10 : vector<256x128xf32>
    %c3 = arith.constant 3 : index
    %c0_10 = arith.constant 0 : index
    %c0_11 = arith.constant 0 : index
    %12 = vector.load %arg1[%c3, %c0_10, %c0_11] : memref<4x256x128xbf16, #tpu.memory_space<vmem>>, vector<1x256x128xbf16>
    %13 = vector.shape_cast %12 : vector<1x256x128xbf16> to vector<256x128xbf16>
    %cst_12 = arith.constant dense<0.000000e+00> : vector<256x128xf32>
    %14 = tpu.matmul %13, %0, %cst_12 {dimension_numbers = #tpu.dot_dimension_numbers<[1], [0], [0], [1], [0, 0, 1, 1], [], []>} : vector<256x128xbf16>, vector<128x128xbf16>, vector<256x128xf32> -> vector<256x128xf32>
    %15 = arith.maximumf %11, %14 : vector<256x128xf32>
    %c0_13 = arith.constant 0 : index
    %c0_14 = arith.constant 0 : index
    %16 = vector.load %arg3[%c0_13, %c0_14] : memref<1x128xf32, #tpu.memory_space<vmem>>, vector<1x128xf32>
    %17 = vector.broadcast %16 : vector<1x128xf32> to vector<256x128xf32>
    %18 = arith.addf %15, %17 : vector<256x128xf32>
    %cst_15 = arith.constant 0.000000e+00 : f32
    %19 = vector.broadcast %cst_15 : f32 to vector<256x128xf32>
    %20 = arith.maximumf %18, %19 : vector<256x128xf32>
    %c0_16 = arith.constant 0 : index
    %c0_17 = arith.constant 0 : index
    %21 = vector.load %arg4[%c0_16, %c0_17] : memref<256x128xf32, #tpu.memory_space<vmem>>, vector<256x128xf32>
    tpu.vector_store %arg4[%c0_16, %c0_17], %20 {strides = array<i32>} : memref<256x128xf32, #tpu.memory_space<vmem>>, vector<256x128xf32>,
    return
  }
  func.func @transform_0(%arg0: i32) -> (i32, i32, i32) {
    %c0_i32 = arith.constant 0 : i32
    %c0_i32_0 = arith.constant 0 : i32
    %c0_i32_1 = arith.constant 0 : i32
    return %c0_i32, %arg0, %c0_i32_0 : i32, i32, i32
  }
  func.func @transform_1(%arg0: i32) -> (i32, i32) {
    %c0_i32 = arith.constant 0 : i32
    %c0_i32_0 = arith.constant 0 : i32
    %c0_i32_1 = arith.constant 0 : i32
    return %c0_i32, %c0_i32_0 : i32, i32
  }
  func.func @transform_2(%arg0: i32) -> (i32, i32) {
    %c0_i32 = arith.constant 0 : i32
    %c0_i32_0 = arith.constant 0 : i32
    %c0_i32_1 = arith.constant 0 : i32
    return %c0_i32, %c0_i32_0 : i32, i32
  }
  func.func @transform_3(%arg0: i32) -> (i32, i32) {
    %c0_i32 = arith.constant 0 : i32
    %c0_i32_0 = arith.constant 0 : i32
    return %arg0, %c0_i32 : i32, i32
  }
}

</mosaic_0001>

<bundles_post_ra>
// kernel: tpu_custom_call.1
= control target key start
LH: loop header
LB: loop body
LE: loop exit
PB: predicated region body
PF: predicated region fallthrough
CT: control target
= control target key end

     0   :  { %8 = vsyncpa [#allocation3], 0  ;;  %s3165_s0 = inlined_call_operand.hbm [shape: bf16[4,512,128], index: 0, kind: input, shape index: {}]   ;;  %s3166_s1 = inlined_call_operand.hbm [shape: bf16[128,128], index: 1, kind: input, shape index: {}]   ;;  %s3167_s2 = inlined_call_operand.vmem [shape: f32[1,128], index: 2, kind: input, shape index: {}]   ;;  %s3168_s3 = inlined_call_operand.hbm [shape: f32[512,128], index: 3, kind: output, shape index: {}]  }
   0x1   :  { %10 = vsyncpa [#allocation3 + $0x1], 0 }
   0x2   :  { %11 = vsyncpa [#allocation6], 0 }
   0x3   :  { %12 = vsyncpa [#allocation4], 0 }
   0x4   :  { %14 = vsyncpa [#allocation4 + $0x1], 0  ;;  %s2501_s12 = smov 0   ;;  %s2503_s13 = smov 0  }
   0x5   :  { %s2505_s14 = smov 0   ;;  %s2507_s15 = smov 0  }
   0x6 LB: > { %s2522_s16 = sadd.s32 4294967295, %s2467_s15   ;;  %s1751_s17 = sadd.s32 4294967294, %s2467_s15   ;;  %s2467_s15 = sphi %s2507_s15, %s3273_s15   ;;  %s2463_s14 = sphi %s2505_s14, %s3272_s14   ;;  %s2459_s13 = sphi %s2503_s13, %s3271_s13   ;;  %s2455_s12 = sphi %s2501_s12, %s3270_s12  }
   0x7   : > { %s2526_s18 = sadd.s32 1, %s2467_s15   ;;  %s27_s19 = sadd.s32 1, %s2463_s14 }
   0x8   : > { %s24_s20 = ssub.s32 %s2467_s15, %s2526_s18  ;;  %p34_p0 = scmp.ne.s32.totalorder %s2463_s14, %s2459_s13 }
   0x9   : > { %p25_p1 = scmp.eq.s32.totalorder %s24_s20, 0  ;;  %p35_p2 = scmp.eq.s32.totalorder %s2467_s15, 0 }
   0xa   : > { %p40_p3 = scmp.ne.s32.totalorder %s2459_s13, %s2455_s12  ;;  %p3169_p4 = scmp.eq.s32.totalorder %s2522_s16, 0 }
   0xb   : > { %s2538_s21 = scalar_select %p25_p1, %s2463_s14, %s27_s19  }
   0xc   : > { %p2540_p5 = por %p35_p2, %p34_p0  ;;  %p2546_p6 = por %p3169_p4, %p40_p3 }
   0xd   : > { %p106_p7 = scmp.eq.s32.totalorder %s2522_s16, 1  ;;  %p112_p8 = scmp.eq.s32.totalorder %s1751_s17, 1 }
   0xe   : > { %s3191_s22 = scalar_select %p2540_p5, 1, 0 }
   0xf   : > { %s3192_s23 = scalar_select %p2546_p6, 1, 0 }
  0x10   : > { %p1752_p9 = scmp.ge.s32.totalorder %s2467_s15, 1  ;;  %p119_p10 = scmp.lt.s32.totalorder %s2467_s15, 3 }
  0x11   : > { %p2553_p11 = por %p106_p7, %p34_p0  ;;  %p2557_p12 = por %p112_p8, %p40_p3 }
  0x12   : > { %p2561_p13 = pnand %p1752_p9, %p119_p10  ;;  %s2469_s27 = smov [#allocation5]  }
  0x13   : > { %s3193_s24 = scalar_select %p2553_p11, 1, 0 }
  0x14   : > { %s3194_s25 = scalar_select %p2557_p12, 1, 0 }
  0x15   : > { %s3195_s26 = scalar_select %p2561_p13, 1, 0 }
  0x16   : > { %p2243_p1 = pneg %p2561_p13  ;;  %s131_s28 = sshll.u32 %s2469_s27, 4  ;;  %s132_s28 = int_to_ptr.vmem [resolvable:$true] %s131_s28 }
  0x17   : > { %s2369_s5 = scalar_lea.hbm %s3166_s1, 1024 }
  0x18   : > { %p2569_p2 = pnand %p2243_p1, %p3169_p4  ;;  %p2370_p0 = scmp.ne.s32.totalorder %s3166_s1, %s2369_s5 }
  0x19   : > { %p2376_p9 = scmp.lt.u32.totalorder %s2369_s5, %s3166_s1 }
  0x1a   : > { %p2371_p3 = pneg %p2569_p2 }
  0x1c   : > { %p2372_p7 = pnand %p2371_p3, %p2370_p0 }
  0x1e   : > { %p2373_p8 = pneg %p2372_p7 }
  0x20   : > { %p2378_p10 = pnand %p2376_p9, %p2373_p8 }
  0x22   : > { %2381 = shalt.err (!%p2378_p10)
}
  0x23   : > { %s2382_s10 = scalar_lea.vmem %s132_s28, 1024  ;;  %p2390_p11 = scmp.lt.s32.totalorder %s132_s28, %s132_s28 }
  0x24   : > { %p2383_p1 = scmp.ne.s32.totalorder %s132_s28, %s2382_s10  ;;  %p2391_p6 = scmp.lt.s32.totalorder %s2382_s10, %s2382_s10 }
  0x26   : > { %p2385_p4 = pnand %p2383_p1, %p2371_p3  ;;  %p2392_p13 = por %p2391_p6, %p2390_p11 }
  0x28   : > { %p2386_p12 = pneg %p2385_p4 }
  0x2a   : > { %p2393_p5 = pnand %p2392_p13, %p2386_p12 }
  0x2c   : > { %2396 = shalt.err (!%p2393_p5)
}
  0x2d   : > { %s2470_s11 = smov 64   ;;  %s2471_s17 = smov 4  }
  0x2e   : > { %2246 = dma.hbm_to_vmem [thread:$0]  (!%p2569_p2), %s3166_s1, 1024, %s132_s28, [#allocation6], %s2470_s11, %s2470_s11, %s2471_s17  }
  0x2f   : > { %p1754_p0 = scmp.ge.s32.totalorder %s2467_s15, 2 }
  0x31   : > { %144 = sbr.rel (%p1754_p0) target bundleno = 71 (0x47), region = 24 }
  0x38   : > { %s148_s27 = sand.u32 1, %s2463_s14   ;;  %s1938_s30 = sshll.u32 %s2467_s15, 11 }
  0x39   : > { %s1755_s29 = sshll.u32 %s148_s27, 9  ;;  %s158_s28 = scalar_lea.hbm %s3165_s0, %s1938_s30 }
  0x3a   : > { %p3197_p4 = scmp.ne.s32.totalorder %s3191_s22, 0  ;;  %s152_s7 = scalar_lea.vmem [#allocation2], %s1755_s29 }
  0x3b   : > { %s171_s8 = sshll.u32 %s152_s7, 4  ;;  %s2472_s10 = smov 4096   ;;  %s172_s8 = int_to_ptr.vmem [resolvable:$true] %s171_s8 }
  0x3c   : > { %s2230_s6 = scalar_select %p3197_p4, [#allocation0], [#allocation10] }
  0x3d   : > { %2231 = sst [smem:[#allocation9]] (%p3197_p4), %s2472_s10  ;;  %s2473_s11 = smov 2048  }
  0x3e   : > { %s163_s9 = sld [smem:[%s2230_s6]]   ;;  %s2474_s17 = smov 32  }
  0x3f   : > { %2232 = sst [smem:[#allocation9 + $0x1]] (%p3197_p4), %s2473_s11  ;;  %s2475_s19 = smov 64  }
  0x40   : > { %2233 = sst [smem:[#allocation9 + $0x2]] (%p3197_p4), %s2474_s17  ;;  %s2476_s30 = smov 4  }
  0x41   : > { %2234 = sst [smem:[#allocation9 + $0x3]] (%p3197_p4), %s2475_s19  ;;  %s149_s4 = scalar_lea.sflag [#allocation3], %s148_s27 }
  0x42   : > { %2235 = sst [smem:[#allocation9 + $0x4]] (%p3197_p4), %s2475_s19  ;;  %s2477_s5 = smov [#allocation8]  }
  0x43   : > { %2236 = sst [smem:[#allocation9 + $0x5]] (%p3197_p4), %s2476_s30 }
  0x44   : > { %s1758_s20 = sshll.u32 %s163_s9, 26 }
  0x45   : > { %s1759_s29 = sadd.s32 134217728, %s1758_s20 }
  0x46   : > { %2237 = dma.general (%p3197_p4), %s158_s28, 8192, %s172_s8, %s149_s4, %s2477_s5, [#allocation9], %s1759_s29, 0  }
  0x47 PF: > { %p3198_p5 = scmp.ne.s32.totalorder %s3195_s26, 0 }
  0x49   : > { %196 = sbr.rel (%p3198_p5) target bundleno = 478 (0x1de), region = 32 }
  0x50   : > { %s2616_s6 = sand.u32 1, %s2459_s13   ;;  %p3199_p6 = scmp.ne.s32.totalorder %s3192_s23, 0 }
  0x51   : > { %s1761_s7 = sshll.u32 %s2616_s6, 9  ;;  %s199_s9 = scalar_lea.sflag [#allocation3], %s2616_s6 }
  0x52   : > { %s2620_s10 = scalar_lea.vmem [#allocation2], %s1761_s7 }
  0x53   : > { %2442 = dma.done.wait (%p3199_p6), %s199_s9, 8192  }
  0x54   : > { %2444 = vsyncadd (%p3199_p6), %s199_s9, 4294959104  ;;  %p3200_p11 = scmp.eq.s32.totalorder %s2522_s16, 0 }
  0x56   : > { %2446 = dma.done.wait (%p3200_p11), [#allocation6], 1024   ;;  %p3201_p12 = pmov %p3200_p11 }
  0x57   : > { %v2297_v0 = vld [vmem:[#allocation5] sm:$0xff]   ;;  %v2298_v1 = vld [vmem:[#allocation5 + $0x8] sm:$0xff]   ;;  %v2630_v2 = vld [vmem:[#allocation5 + $0x10] sm:$0xff]   ;;  %s1763_s26 = sshll.u32 %s2616_s6, 8  ;;  %s1939_s28 = sshll.u32 %s2522_s16, 12 }
  0x58   : > { %2448 = vsyncadd (%p3201_p12), [#allocation6], 4294966272  ;;  %2036 = vmatprep.subr.bf16.mxu0 %v2297_v0  ;;  %2084 = vmatprep.subr.bf16.mxu1 %v2297_v0  ;;  %v2632_v3 = vld [vmem:[#allocation5 + $0x18] sm:$0xff]   ;;  %v2305_v4 = vld [vmem:[%s2620_s10] sm:$0xff]   ;;  %s2968_s27 = scalar_lea.vmem [#allocation7], %s1763_s26  ;;  %s3116_s19 = scalar_lea.hbm %s3168_s3, %s1939_s28 }
  0x59   : > { %2037 = vmatpush3.bf16.msra.mxu0 %v2297_v0  ;;  %2085 = vmatpush3.bf16.msra.mxu1 %v2297_v0  ;;  %v2306_v5 = vld [vmem:[%s2620_s10 + $0x80] sm:$0xff]   ;;  %v2648_v7 = vld [vmem:[#allocation5 + $0x28] sm:$0xff]   ;;  %v2654_v8 = vld [vmem:[#allocation5 + $0x30] sm:$0xff]   ;;  %s1668_s8 = sshll.u32 %s2968_s27, 4  ;;  %s1655_s16 = scalar_lea.sflag [#allocation4], %s2616_s6  ;;  %s3118_s8 = int_to_ptr.vmem [resolvable:$true] %s1668_s8 }
  0x5a   : > { %2038 = vmatprep.subr.bf16.mxu0 %v2298_v1  ;;  %2086 = vmatprep.subr.bf16.mxu1 %v2298_v1  ;;  %v2642_v6 = vld [vmem:[#allocation5 + $0x20] sm:$0xff]   ;;  %v2660_v9 = vld [vmem:[#allocation5 + $0x38] sm:$0xff]   ;;  %v2307_v10 = vld [vmem:[%s2620_s10 + $0x8] sm:$0xff]   ;;  %s2397_s20 = scalar_lea.vmem %s3118_s8, 4096  ;;  %p3268_p2 = scmp.ne.s32.totalorder %s3193_s24, 0 }
  0x5b   : > { %2052 = vmatprep.mubr.bf16.mxu0 %v2305_v4  ;;  %2100 = vmatprep.mubr.bf16.mxu1 %v2306_v5  ;;  %v2308_v11 = vld [vmem:[%s2620_s10 + $0x88] sm:$0xff]   ;;  %v2309_v12 = vld [vmem:[%s2620_s10 + $0x10] sm:$0xff]   ;;  %v2311_v14 = vld [vmem:[%s2620_s10 + $0x18] sm:$0xff]   ;;  %p2398_p13 = scmp.ne.s32.totalorder %s3118_s8, %s2397_s20  ;;  %s2478_s30 = smov [#allocation7]  }
  0x5c   : > { %v2310_v13 = vld [vmem:[%s2620_s10 + $0x90] sm:$0xff]   ;;  %v2312_v15 = vld [vmem:[%s2620_s10 + $0x98] sm:$0xff]   ;;  %v2313_v16 = vld [vmem:[%s2620_s10 + $0x20] sm:$0xff]   ;;  %s2401_s29 = sshll.u32 %s2478_s30, 4  ;;  %s2402_s29 = int_to_ptr.vmem [resolvable:$false] %s2401_s29 }
  0x5d   : > { %2039 = vmatpush3.bf16.msra.mxu0 %v2298_v1  ;;  %2087 = vmatpush3.bf16.msra.mxu1 %v2298_v1  ;;  %v2314_v17 = vld [vmem:[%s2620_s10 + $0xa0] sm:$0xff]   ;;  %v2315_v18 = vld [vmem:[%s2620_s10 + $0x28] sm:$0xff]   ;;  %v2317_v20 = vld [vmem:[%s2620_s10 + $0x30] sm:$0xff]   ;;  %p2399_p3 = pnand %p2398_p13, %p3268_p2  ;;  %s2403_s4 = scalar_lea.vmem %s2402_s29, 8192 }
  0x5e   : > { %2040 = vmatprep.subr.bf16.mxu0 %v2630_v2  ;;  %2088 = vmatprep.subr.bf16.mxu1 %v2630_v2  ;;  %v2316_v19 = vld [vmem:[%s2620_s10 + $0xa8] sm:$0xff]   ;;  %v2318_v21 = vld [vmem:[%s2620_s10 + $0xb0] sm:$0xff]   ;;  %v2319_v22 = vld [vmem:[%s2620_s10 + $0x38] sm:$0xff]   ;;  %p2404_p8 = scmp.lt.s32.totalorder %s3118_s8, %s2402_s29  ;;  %p2405_p9 = scmp.lt.s32.totalorder %s2403_s4, %s2397_s20 }
  0x5f   : > { %v2320_v23 = vld [vmem:[%s2620_s10 + $0xb8] sm:$0xff]   ;;  %v2321_v24 = vld [vmem:[%s2620_s10 + $0x40] sm:$0xff]   ;;  %v2323_v26 = vld [vmem:[%s2620_s10 + $0x48] sm:$0xff]   ;;  %p2400_p7 = pneg %p2399_p3 }
  0x60   : > { %v2322_v25 = vld [vmem:[%s2620_s10 + $0xc0] sm:$0xff]   ;;  %v2324_v27 = vld [vmem:[%s2620_s10 + $0xc8] sm:$0xff]   ;;  %v2325_v28 = vld [vmem:[%s2620_s10 + $0x50] sm:$0xff]   ;;  %p2406_p10 = por %p2405_p9, %p2404_p8 }
  0x61   : > { %2041 = vmatpush3.bf16.msra.mxu0 %v2630_v2  ;;  %2089 = vmatpush3.bf16.msra.mxu1 %v2630_v2  ;;  %v2326_v29 = vld [vmem:[%s2620_s10 + $0xd0] sm:$0xff]   ;;  %v2327_v30 = vld [vmem:[%s2620_s10 + $0x58] sm:$0xff]   ;;  %v2329_v32 = vld [vmem:[%s2620_s10 + $0x60] sm:$0xff]  }
  0x62   : > { %2042 = vmatprep.subr.bf16.mxu0 %v2632_v3  ;;  %2090 = vmatprep.subr.bf16.mxu1 %v2632_v3  ;;  %v2328_v31 = vld [vmem:[%s2620_s10 + $0xd8] sm:$0xff]   ;;  %v2330_v33 = vld [vmem:[%s2620_s10 + $0xe0] sm:$0xff]   ;;  %v2331_v34 = vld [vmem:[%s2620_s10 + $0x68] sm:$0xff]   ;;  %p2407_p1 = pnand %p2406_p10, %p2400_p7 }
  0x63   : > { %v2332_v35 = vld [vmem:[%s2620_s10 + $0xe8] sm:$0xff]   ;;  %v2333_v36 = vld [vmem:[%s2620_s10 + $0x70] sm:$0xff]   ;;  %v2335_v38 = vld [vmem:[%s2620_s10 + $0x78] sm:$0xff]  }
  0x64   : > { %v2334_v37 = vld [vmem:[%s2620_s10 + $0xf0] sm:$0xff]   ;;  %v2336_v39 = vld [vmem:[%s2620_s10 + $0xf8] sm:$0xff]   ;;  %v2337_v40 = vld [vmem:[%s2620_s10 + $0x100] sm:$0xff]  }
  0x65   : > { %2043 = vmatpush3.bf16.msra.mxu0 %v2632_v3  ;;  %2091 = vmatpush3.bf16.msra.mxu1 %v2632_v3  ;;  %v2338_v41 = vld [vmem:[%s2620_s10 + $0x180] sm:$0xff]   ;;  %v2339_v42 = vld [vmem:[%s2620_s10 + $0x108] sm:$0xff]   ;;  %v2341_v44 = vld [vmem:[%s2620_s10 + $0x110] sm:$0xff]  }
  0x66   : > { %2044 = vmatprep.subr.bf16.mxu0 %v2642_v6  ;;  %2092 = vmatprep.subr.bf16.mxu1 %v2642_v6  ;;  %v2340_v43 = vld [vmem:[%s2620_s10 + $0x188] sm:$0xff]   ;;  %v2342_v45 = vld [vmem:[%s2620_s10 + $0x190] sm:$0xff]   ;;  %v2343_v46 = vld [vmem:[%s2620_s10 + $0x118] sm:$0xff]  }
  0x67   : > { %v2344_v47 = vld [vmem:[%s2620_s10 + $0x198] sm:$0xff]   ;;  %v2345_v48 = vld [vmem:[%s2620_s10 + $0x120] sm:$0xff]   ;;  %v2347_v50 = vld [vmem:[%s2620_s10 + $0x128] sm:$0xff]  }
  0x68   : > { %v2346_v49 = vld [vmem:[%s2620_s10 + $0x1a0] sm:$0xff]   ;;  %v2348_v51 = vld [vmem:[%s2620_s10 + $0x1a8] sm:$0xff]   ;;  %v2349_v52 = vld [vmem:[%s2620_s10 + $0x130] sm:$0xff]  }
  0x69   : > { %2045 = vmatpush3.bf16.msra.mxu0 %v2642_v6  ;;  %2093 = vmatpush3.bf16.msra.mxu1 %v2642_v6  ;;  %v2350_v53 = vld [vmem:[%s2620_s10 + $0x1b0] sm:$0xff]   ;;  %v2351_v54 = vld [vmem:[%s2620_s10 + $0x138] sm:$0xff]   ;;  %v2353_v56 = vld [vmem:[%s2620_s10 + $0x140] sm:$0xff]  }
  0x6a   : > { %2046 = vmatprep.subr.bf16.mxu0 %v2648_v7  ;;  %2094 = vmatprep.subr.bf16.mxu1 %v2648_v7  ;;  %v2352_v55 = vld [vmem:[%s2620_s10 + $0x1b8] sm:$0xff]   ;;  %v2354_v57 = vld [vmem:[%s2620_s10 + $0x1c0] sm:$0xff]   ;;  %v2355_v58 = vld [vmem:[%s2620_s10 + $0x148] sm:$0xff]  }
  0x6b   : > { %v2356_v59 = vld [vmem:[%s2620_s10 + $0x1c8] sm:$0xff]   ;;  %v2357_v60 = vld [vmem:[%s2620_s10 + $0x150] sm:$0xff]   ;;  %v2359_v62 = vld [vmem:[%s2620_s10 + $0x158] sm:$0xff]  }
  0x6c   : > { %v2358_v61 = vld [vmem:[%s2620_s10 + $0x1d0] sm:$0xff]   ;;  %v2360_v63 = vld [vmem:[%s2620_s10 + $0x1d8] sm:$0xff]  }
  0x6d   : > { %2047 = vmatpush3.bf16.msra.mxu0 %v2648_v7  ;;  %2095 = vmatpush3.bf16.msra.mxu1 %v2648_v7  ;;  %v2365_v4 = vld [vmem:[%s2620_s10 + $0x170] sm:$0xff]  }
  0x6e   : > { %2048 = vmatprep.subr.bf16.mxu0 %v2654_v8  ;;  %2096 = vmatprep.subr.bf16.mxu1 %v2654_v8  ;;  %v2366_v5 = vld [vmem:[%s2620_s10 + $0x1f0] sm:$0xff]  }
  0x71   : > { %2049 = vmatpush3.bf16.msra.mxu0 %v2654_v8  ;;  %2097 = vmatpush3.bf16.msra.mxu1 %v2654_v8 }
  0x72   : > { %2050 = vmatprep.subr.bf16.mxu0 %v2660_v9  ;;  %2098 = vmatprep.subr.bf16.mxu1 %v2660_v9 }
  0x75   : > { %2051 = vmatpush3.bf16.msra.mxu0 %v2660_v9  ;;  %2099 = vmatpush3.bf16.msra.mxu1 %v2660_v9 }
  0x76   : > { %2132 = vmatprep.subr.bf16.mxu0 %v2297_v0  ;;  %2180 = vmatprep.subr.bf16.mxu1 %v2297_v0 }
  0x78   : > { %2053 = vmatmul.mubr.bf16.vlgmr.msra.gmra.mrb[0].mxu0 %v2307_v10  ;;  %2101 = vmatmul.mubr.bf16.vlgmr.msra.gmra.mrb[0].mxu1 %v2308_v11 }
  0x79   : > { %2133 = vmatpush3.bf16.msra.mxu0 %v2297_v0  ;;  %2181 = vmatpush3.bf16.msra.mxu1 %v2297_v0  ;;  %v2361_v0 = vld [vmem:[%s2620_s10 + $0x160] sm:$0xff]  }
  0x7a   : > { %2056 = vmatprep.mubr.bf16.mxu0 %v2309_v12  ;;  %2104 = vmatprep.mubr.bf16.mxu1 %v2310_v13 }
  0x7b   : > { %2134 = vmatprep.subr.bf16.mxu0 %v2298_v1  ;;  %2182 = vmatprep.subr.bf16.mxu1 %v2298_v1 }
  0x7d   : > { %2135 = vmatpush3.bf16.msra.mxu0 %v2298_v1  ;;  %2183 = vmatpush3.bf16.msra.mxu1 %v2298_v1  ;;  %v2362_v1 = vld [vmem:[%s2620_s10 + $0x1e0] sm:$0xff]  }
  0x7e   : > { %2136 = vmatprep.subr.bf16.mxu0 %v2630_v2  ;;  %2184 = vmatprep.subr.bf16.mxu1 %v2630_v2 }
  0x80   : > { %2057 = vmatmul.mubr.bf16.gmra.mrb[4].mxu0 %v2311_v14  ;;  %2105 = vmatmul.mubr.bf16.gmra.mrb[4].mxu1 %v2312_v15 }
  0x81   : > { %2060 = vmatprep.mubr.bf16.mxu0 %v2313_v16  ;;  %2108 = vmatprep.mubr.bf16.mxu1 %v2314_v17 }
  0x82   : > { %2137 = vmatpush3.bf16.msra.mxu0 %v2630_v2  ;;  %2185 = vmatpush3.bf16.msra.mxu1 %v2630_v2  ;;  %v2363_v2 = vld [vmem:[%s2620_s10 + $0x168] sm:$0xff]  }
  0x83   : > { %2138 = vmatprep.subr.bf16.mxu0 %v2632_v3  ;;  %2186 = vmatprep.subr.bf16.mxu1 %v2632_v3 }
  0x86   : > { %2139 = vmatpush3.bf16.msra.mxu0 %v2632_v3  ;;  %2187 = vmatpush3.bf16.msra.mxu1 %v2632_v3  ;;  %v2364_v3 = vld [vmem:[%s2620_s10 + $0x1e8] sm:$0xff]  }
  0x87   : > { %2140 = vmatprep.subr.bf16.mxu0 %v2642_v6  ;;  %2188 = vmatprep.subr.bf16.mxu1 %v2642_v6 }
  0x88   : > { %2061 = vmatmul.mubr.bf16.gmra.mrb[8].mxu0 %v2315_v18  ;;  %2109 = vmatmul.mubr.bf16.gmra.mrb[8].mxu1 %v2316_v19 }
  0x89   : > { %2064 = vmatprep.mubr.bf16.mxu0 %v2317_v20  ;;  %2112 = vmatprep.mubr.bf16.mxu1 %v2318_v21 }
  0x8a   : > { %2141 = vmatpush3.bf16.msra.mxu0 %v2642_v6  ;;  %2189 = vmatpush3.bf16.msra.mxu1 %v2642_v6  ;;  %v2367_v6 = vld [vmem:[%s2620_s10 + $0x178] sm:$0xff]  }
  0x8b   : > { %2142 = vmatprep.subr.bf16.mxu0 %v2648_v7  ;;  %2190 = vmatprep.subr.bf16.mxu1 %v2648_v7 }
  0x8e   : > { %2143 = vmatpush3.bf16.msra.mxu0 %v2648_v7  ;;  %2191 = vmatpush3.bf16.msra.mxu1 %v2648_v7  ;;  %v2368_v7 = vld [vmem:[%s2620_s10 + $0x1f8] sm:$0xff]  }
  0x8f   : > { %2144 = vmatprep.subr.bf16.mxu0 %v2654_v8  ;;  %2192 = vmatprep.subr.bf16.mxu1 %v2654_v8 }
  0x90   : > { %2065 = vmatmul.mubr.bf16.gmra.mrb[12].mxu0 %v2319_v22  ;;  %2113 = vmatmul.mubr.bf16.gmra.mrb[12].mxu1 %v2320_v23 }
  0x91   : > { %2068 = vmatprep.mubr.bf16.mxu0 %v2321_v24  ;;  %2116 = vmatprep.mubr.bf16.mxu1 %v2322_v25 }
  0x92   : > { %2145 = vmatpush3.bf16.msra.mxu0 %v2654_v8  ;;  %2193 = vmatpush3.bf16.msra.mxu1 %v2654_v8 }
  0x93   : > { %2146 = vmatprep.subr.bf16.mxu0 %v2660_v9  ;;  %2194 = vmatprep.subr.bf16.mxu1 %v2660_v9 }
  0x96   : > { %2147 = vmatpush3.bf16.msra.mxu0 %v2660_v9  ;;  %2195 = vmatpush3.bf16.msra.mxu1 %v2660_v9 }
  0x98   : > { %2069 = vmatmul.mubr.bf16.gmra.mrb[16].mxu0 %v2323_v26  ;;  %2117 = vmatmul.mubr.bf16.gmra.mrb[16].mxu1 %v2324_v27 }
  0x99   : > { %2072 = vmatprep.mubr.bf16.mxu0 %v2325_v28  ;;  %2120 = vmatprep.mubr.bf16.mxu1 %v2326_v29 }
  0xa0   : > { %2073 = vmatmul.mubr.bf16.gmra.mrb[20].mxu0 %v2327_v30  ;;  %2121 = vmatmul.mubr.bf16.gmra.mrb[20].mxu1 %v2328_v31 }
  0xa1   : > { %2076 = vmatprep.mubr.bf16.mxu0 %v2329_v32  ;;  %2124 = vmatprep.mubr.bf16.mxu1 %v2330_v33 }
  0xa8   : > { %2077 = vmatmul.mubr.bf16.gmra.mrb[24].mxu0 %v2331_v34  ;;  %2125 = vmatmul.mubr.bf16.gmra.mrb[24].mxu1 %v2332_v35 }
  0xa9   : > { %2080 = vmatprep.mubr.bf16.mxu0 %v2333_v36  ;;  %2128 = vmatprep.mubr.bf16.mxu1 %v2334_v37 }
  0xb0   : > { %2081 = vmatmul.mubr.bf16.gmra.mrb[28].mxu0 %v2335_v38  ;;  %2129 = vmatmul.mubr.bf16.gmra.mrb[28].mxu1 %v2336_v39 }
  0xb1   : > { %2148 = vmatprep.mubr.bf16.mxu0 %v2337_v40  ;;  %2196 = vmatprep.mubr.bf16.mxu1 %v2338_v41 }
  0xb8   : > { %2149 = vmatmul.mubr.bf16.vlgmr.msra.gmra.mrb[32].mxu0 %v2339_v42  ;;  %2197 = vmatmul.mubr.bf16.vlgmr.msra.gmra.mrb[32].mxu1 %v2340_v43 }
  0xb9   : > { %2152 = vmatprep.mubr.bf16.mxu0 %v2341_v44  ;;  %2200 = vmatprep.mubr.bf16.mxu1 %v2342_v45 }
  0xc0   : > { %2153 = vmatmul.mubr.bf16.gmra.mrb[36].mxu0 %v2343_v46  ;;  %2201 = vmatmul.mubr.bf16.gmra.mrb[36].mxu1 %v2344_v47 }
  0xc1   : > { %2156 = vmatprep.mubr.bf16.mxu0 %v2345_v48  ;;  %2204 = vmatprep.mubr.bf16.mxu1 %v2346_v49 }
  0xc8   : > { %2157 = vmatmul.mubr.bf16.gmra.mrb[40].mxu0 %v2347_v50  ;;  %2205 = vmatmul.mubr.bf16.gmra.mrb[40].mxu1 %v2348_v51 }
  0xc9   : > { %2160 = vmatprep.mubr.bf16.mxu0 %v2349_v52  ;;  %2208 = vmatprep.mubr.bf16.mxu1 %v2350_v53 }
  0xd0   : > { %2161 = vmatmul.mubr.bf16.gmra.mrb[44].mxu0 %v2351_v54  ;;  %2209 = vmatmul.mubr.bf16.gmra.mrb[44].mxu1 %v2352_v55 }
  0xd1   : > { %2164 = vmatprep.mubr.bf16.mxu0 %v2353_v56  ;;  %2212 = vmatprep.mubr.bf16.mxu1 %v2354_v57 }
  0xd8   : > { %2165 = vmatmul.mubr.bf16.gmra.mrb[48].mxu0 %v2355_v58  ;;  %2213 = vmatmul.mubr.bf16.gmra.mrb[48].mxu1 %v2356_v59 }
  0xd9   : > { %2168 = vmatprep.mubr.bf16.mxu0 %v2357_v60  ;;  %2216 = vmatprep.mubr.bf16.mxu1 %v2358_v61 }
  0xe0   : > { %2169 = vmatmul.mubr.bf16.gmra.mrb[52].mxu0 %v2359_v62  ;;  %2217 = vmatmul.mubr.bf16.gmra.mrb[52].mxu1 %v2360_v63 }
  0xe1   : > { %2172 = vmatprep.mubr.bf16.mxu0 %v2361_v0  ;;  %2220 = vmatprep.mubr.bf16.mxu1 %v2362_v1 }
  0xe8   : > { %2173 = vmatmul.mubr.bf16.gmra.mrb[56].mxu0 %v2363_v2  ;;  %2221 = vmatmul.mubr.bf16.gmra.mrb[56].mxu1 %v2364_v3 }
  0xe9   : > { %2176 = vmatprep.mubr.bf16.mxu0 %v2365_v4  ;;  %2224 = vmatprep.mubr.bf16.mxu1 %v2366_v5 }
  0xf0   : > { %2177 = vmatmul.mubr.bf16.gmra.mrb[60].mxu0 %v2367_v6  ;;  %2225 = vmatmul.mubr.bf16.gmra.mrb[60].mxu1 %v2368_v7 }
 0x14b   : > { %v2754_v8 = vpop.f32.mrb[0].mxu0  ;;  %v2756_v9 = vpop.f32.mrb[0].mxu1 }
 0x14c   : > { %v2760_v11 = vpop.f32.mrb[1].mxu0  ;;  %v2762_v12 = vpop.f32.mrb[1].mxu1  ;;  %v3219_v6 = vmax.f32 %v2754_v8, %v2756_v9 }
 0x14d   : > { %v2766_v14 = vpop.f32.mrb[2].mxu0  ;;  %v2768_v15 = vpop.f32.mrb[2].mxu1  ;;  %v3220_v0 = vmax.f32 %v2760_v11, %v2762_v12 }
 0x14e   : > { %v2772_v17 = vpop.f32.mrb[3].mxu0  ;;  %v2774_v18 = vpop.f32.mrb[3].mxu1 }
 0x153   : > { %v2778_v20 = vpop.f32.mrb[4].mxu0  ;;  %v2780_v21 = vpop.f32.mrb[4].mxu1 }
 0x154   : > { %v2784_v23 = vpop.f32.mrb[5].mxu0  ;;  %v2786_v24 = vpop.f32.mrb[5].mxu1 }
 0x155   : > { %v2790_v26 = vpop.f32.mrb[6].mxu0  ;;  %v2792_v27 = vpop.f32.mrb[6].mxu1 }
 0x156   : > { %v2796_v29 = vpop.f32.mrb[7].mxu0  ;;  %v2798_v30 = vpop.f32.mrb[7].mxu1 }
 0x15b   : > { %v2802_v32 = vpop.f32.mrb[8].mxu0  ;;  %v2804_v33 = vpop.f32.mrb[8].mxu1 }
 0x15c   : > { %v2808_v35 = vpop.f32.mrb[9].mxu0  ;;  %v2810_v36 = vpop.f32.mrb[9].mxu1 }
 0x15d   : > { %v2814_v38 = vpop.f32.mrb[10].mxu0  ;;  %v2816_v39 = vpop.f32.mrb[10].mxu1 }
 0x15e   : > { %v2820_v41 = vpop.f32.mrb[11].mxu0  ;;  %v2822_v42 = vpop.f32.mrb[11].mxu1 }
 0x163   : > { %v2826_v44 = vpop.f32.mrb[12].mxu0  ;;  %v2828_v45 = vpop.f32.mrb[12].mxu1 }
 0x164   : > { %v2832_v47 = vpop.f32.mrb[13].mxu0  ;;  %v2834_v48 = vpop.f32.mrb[13].mxu1 }
 0x165   : > { %v2838_v50 = vpop.f32.mrb[14].mxu0  ;;  %v2840_v51 = vpop.f32.mrb[14].mxu1 }
 0x166   : > { %v2844_v53 = vpop.f32.mrb[15].mxu0  ;;  %v2846_v54 = vpop.f32.mrb[15].mxu1 }
 0x16b   : > { %v2850_v56 = vpop.f32.mrb[16].mxu0  ;;  %v2852_v57 = vpop.f32.mrb[16].mxu1 }
 0x16c   : > { %v2856_v59 = vpop.f32.mrb[17].mxu0  ;;  %v2858_v60 = vpop.f32.mrb[17].mxu1 }
 0x16d   : > { %v2862_v62 = vpop.f32.mrb[18].mxu0  ;;  %v2864_v63 = vpop.f32.mrb[18].mxu1 }
 0x16e   : > { %v2868_v1 = vpop.f32.mrb[19].mxu0  ;;  %v2870_v2 = vpop.f32.mrb[19].mxu1 }
 0x173   : > { %v2874_v4 = vpop.f32.mrb[20].mxu0  ;;  %v2876_v5 = vpop.f32.mrb[20].mxu1 }
 0x174   : > { %v2880_v7 = vpop.f32.mrb[21].mxu0  ;;  %v2882_v61 = vpop.f32.mrb[21].mxu1 }
 0x175   : > { %v2886_v58 = vpop.f32.mrb[22].mxu0  ;;  %v2888_v55 = vpop.f32.mrb[22].mxu1 }
 0x176   : > { %v2892_v52 = vpop.f32.mrb[23].mxu0  ;;  %v2894_v49 = vpop.f32.mrb[23].mxu1 }
 0x177   : > { %3202 = vst [vmem:[#allocation14_spill] sm:$0xff] %v2894_v49 }
 0x17b   : > { %v2898_v46 = vpop.f32.mrb[24].mxu0  ;;  %v2900_v43 = vpop.f32.mrb[24].mxu1 }
 0x17c   : > { %3203 = vst [vmem:[#allocation15_spill] sm:$0xff] %v2898_v46  ;;  %3204 = vst [vmem:[#allocation16_spill] sm:$0xff] %v2900_v43  ;;  %v2904_v40 = vpop.f32.mrb[25].mxu0  ;;  %v2906_v37 = vpop.f32.mrb[25].mxu1 }
 0x17d   : > { %3205 = vst [vmem:[#allocation17_spill] sm:$0xff] %v2904_v40  ;;  %3206 = vst [vmem:[#allocation18_spill] sm:$0xff] %v2906_v37  ;;  %v2910_v34 = vpop.f32.mrb[26].mxu0  ;;  %v2912_v31 = vpop.f32.mrb[26].mxu1  ;;  %v2952_v37 = vld [vmem:[%s3167_s2] ss:$0 sm:$0xff] }
 0x17e   : > { %3207 = vst [vmem:[#allocation19_spill] sm:$0xff] %v2910_v34  ;;  %3208 = vst [vmem:[#allocation20_spill] sm:$0xff] %v2912_v31  ;;  %v2916_v28 = vpop.f32.mrb[27].mxu0  ;;  %v2918_v25 = vpop.f32.mrb[27].mxu1 }
 0x17f   : > { %3209 = vst [vmem:[#allocation21_spill] sm:$0xff] %v2916_v28  ;;  %3210 = vst [vmem:[#allocation22_spill] sm:$0xff] %v2918_v25 }
 0x183   : > { %v2922_v22 = vpop.f32.mrb[28].mxu0  ;;  %v2924_v19 = vpop.f32.mrb[28].mxu1 }
 0x184   : > { %3211 = vst [vmem:[#allocation23_spill] sm:$0xff] %v2922_v22  ;;  %3212 = vst [vmem:[#allocation24_spill] sm:$0xff] %v2924_v19  ;;  %v2928_v16 = vpop.f32.mrb[29].mxu0  ;;  %v2930_v13 = vpop.f32.mrb[29].mxu1 }
 0x185   : > { %3213 = vst [vmem:[#allocation25_spill] sm:$0xff] %v2928_v16  ;;  %3214 = vst [vmem:[#allocation26_spill] sm:$0xff] %v2930_v13  ;;  %v2934_v10 = vpop.f32.mrb[30].mxu0  ;;  %v2936_v31 = vpop.f32.mrb[30].mxu1 }
 0x186   : > { %3215 = vst [vmem:[#allocation27_spill] sm:$0xff] %v2934_v10  ;;  %3216 = vst [vmem:[#allocation28_spill] sm:$0xff] %v2936_v31  ;;  %v2940_v25 = vpop.f32.mrb[31].mxu0  ;;  %v2942_v28 = vpop.f32.mrb[31].mxu1 }
 0x187   : > { %3217 = vst [vmem:[#allocation29_spill] sm:$0xff] %v2940_v25  ;;  %3218 = vst [vmem:[#allocation30_spill] sm:$0xff] %v2942_v28  ;;  %v3221_v28 = vmax.f32 %v2766_v14, %v2768_v15  ;;  %v3222_v25 = vmax.f32 %v2772_v17, %v2774_v18  ;;  %v3223_v18 = vmax.f32 %v2778_v20, %v2780_v21 }
 0x18b   : > { %v2150_v19 = vpop.f32.mrb[32].mxu0  ;;  %v2198_v22 = vpop.f32.mrb[32].mxu1 }
 0x18c   : > { %v1199_v13 = vmax.f32 %v3219_v6, %v2150_v19  ;;  %v1070_v16 = vpop.f32.mrb[33].mxu0  ;;  %v1392_v34 = vpop.f32.mrb[33].mxu1 }
 0x18d   : > { %v1197_v31 = vmax.f32 %v3220_v0, %v1070_v16  ;;  %v2151_v10 = vpop.f32.mrb[34].mxu0  ;;  %v2199_v40 = vpop.f32.mrb[34].mxu1 }
 0x18e   : > { %v1521_v3 = vmax.f32 %v1199_v13, %v2198_v22  ;;  %v1200_v8 = vmax.f32 %v3221_v28, %v2151_v10  ;;  %v1073_v9 = vpop.f32.mrb[35].mxu0  ;;  %v1395_v19 = vpop.f32.mrb[35].mxu1 }
 0x18f   : > { %v1519_v6 = vmax.f32 %v1197_v31, %v1392_v34  ;;  %v1198_v43 = vmax.f32 %v3222_v25, %v1073_v9 }
 0x190   : > { %v1560_v46 = vadd.f32 %v2952_v37, %v1521_v3  ;;  %v1522_v49 = vmax.f32 %v1200_v8, %v2199_v40  ;;  %v3224_v40 = vmax.f32 %v2784_v23, %v2786_v24  ;;  %v3225_v3 = vmax.f32 %v2790_v26, %v2792_v27 }
 0x191   : > { %v1558_v11 = vadd.f32 %v2952_v37, %v1519_v6  ;;  %v1520_v12 = vmax.f32 %v1198_v43, %v1395_v19  ;;  %v3226_v19 = vmax.f32 %v2796_v29, %v2798_v30  ;;  %v3227_v30 = vmax.f32 %v2802_v32, %v2804_v33 }
 0x192   : > { %v1592_v16 = vmax.f32 %v1560_v46, 0.0  ;;  %v1561_v13 = vadd.f32 %v2952_v37, %v1522_v49 }
 0x193   : > { %v1590_v22 = vmax.f32 %v1558_v11, 0.0  ;;  %v1559_v14 = vadd.f32 %v2952_v37, %v1520_v12  ;;  %v2154_v10 = vpop.f32.mrb[36].mxu0  ;;  %v2202_v15 = vpop.f32.mrb[36].mxu1 }
 0x194   : > { %1624 = vst [vmem:[%s2968_s27 + $0x10] sm:$0xff] %v1592_v16  ;;  %v1593_v17 = vmax.f32 %v1561_v13, 0.0  ;;  %v1203_v25 = vmax.f32 %v3223_v18, %v2154_v10  ;;  %v1086_v28 = vpop.f32.mrb[37].mxu0  ;;  %v1408_v31 = vpop.f32.mrb[37].mxu1 }
 0x195   : > { %1622 = vst [vmem:[%s2968_s27] sm:$0xff] %v1590_v22  ;;  %v1591_v34 = vmax.f32 %v1559_v14, 0.0  ;;  %v1201_v43 = vmax.f32 %v3224_v40, %v1086_v28  ;;  %v2155_v46 = vpop.f32.mrb[38].mxu0  ;;  %v2203_v49 = vpop.f32.mrb[38].mxu1 }
 0x196   : > { %1625 = vst [vmem:[%s2968_s27 + $0x18] sm:$0xff] %v1593_v17  ;;  %v1525_v0 = vmax.f32 %v1203_v25, %v2202_v15  ;;  %v1204_v8 = vmax.f32 %v3225_v3, %v2155_v46  ;;  %v1089_v9 = vpop.f32.mrb[39].mxu0  ;;  %v1411_v20 = vpop.f32.mrb[39].mxu1  ;;  %v3228_v25 = vmax.f32 %v2808_v35, %v2810_v36 }
 0x197   : > { %1623 = vst [vmem:[%s2968_s27 + $0x8] sm:$0xff] %v1591_v34  ;;  %v1523_v21 = vmax.f32 %v1201_v43, %v1408_v31  ;;  %v1202_v6 = vmax.f32 %v3226_v19, %v1089_v9  ;;  %v3229_v43 = vmax.f32 %v2814_v38, %v2816_v39 }
 0x198   : > { %v1564_v23 = vadd.f32 %v2952_v37, %v1525_v0  ;;  %v1526_v24 = vmax.f32 %v1204_v8, %v2203_v49  ;;  %v3230_v0 = vmax.f32 %v2820_v41, %v2822_v42  ;;  %v3231_v42 = vmax.f32 %v2826_v44, %v2828_v45 }
 0x199   : > { %v1562_v11 = vadd.f32 %v2952_v37, %v1523_v21  ;;  %v1524_v12 = vmax.f32 %v1202_v6, %v1411_v20 }
 0x19a   : > { %v1596_v16 = vmax.f32 %v1564_v23, 0.0  ;;  %v1565_v26 = vadd.f32 %v2952_v37, %v1526_v24 }
 0x19b   : > { %v1594_v27 = vmax.f32 %v1562_v11, 0.0  ;;  %v1563_v13 = vadd.f32 %v2952_v37, %v1524_v12  ;;  %v2158_v22 = vpop.f32.mrb[40].mxu0  ;;  %v2206_v14 = vpop.f32.mrb[40].mxu1 }
 0x19c   : > { %1628 = vst [vmem:[%s2968_s27 + $0x30] sm:$0xff] %v1596_v16  ;;  %v1597_v29 = vmax.f32 %v1565_v26, 0.0  ;;  %v1207_v10 = vmax.f32 %v3227_v30, %v2158_v22  ;;  %v1102_v15 = vpop.f32.mrb[41].mxu0  ;;  %v1424_v17 = vpop.f32.mrb[41].mxu1  ;;  %v3232_v16 = vmax.f32 %v2832_v47, %v2834_v48 }
 0x19d   : > { %1626 = vst [vmem:[%s2968_s27 + $0x20] sm:$0xff] %v1594_v27  ;;  %v1595_v18 = vmax.f32 %v1563_v13, 0.0  ;;  %v1205_v28 = vmax.f32 %v3228_v25, %v1102_v15  ;;  %v2159_v31 = vpop.f32.mrb[42].mxu0  ;;  %v2207_v34 = vpop.f32.mrb[42].mxu1 }
 0x19e   : > { %1629 = vst [vmem:[%s2968_s27 + $0x38] sm:$0xff] %v1597_v29  ;;  %v1529_v40 = vmax.f32 %v1207_v10, %v2206_v14  ;;  %v1208_v46 = vmax.f32 %v3229_v43, %v2159_v31  ;;  %v1105_v49 = vpop.f32.mrb[43].mxu0  ;;  %v1427_v32 = vpop.f32.mrb[43].mxu1  ;;  %v3233_v14 = vmax.f32 %v2838_v50, %v2840_v51  ;;  %v3234_v10 = vmax.f32 %v2844_v53, %v2846_v54 }
 0x19f   : > { %1627 = vst [vmem:[%s2968_s27 + $0x28] sm:$0xff] %v1595_v18  ;;  %v1527_v33 = vmax.f32 %v1205_v28, %v1424_v17  ;;  %v1206_v3 = vmax.f32 %v3230_v0, %v1105_v49  ;;  %v3235_v54 = vmax.f32 %v2850_v56, %v2852_v57 }
 0x1a0   : > { %v1568_v35 = vadd.f32 %v2952_v37, %v1529_v40  ;;  %v1530_v36 = vmax.f32 %v1208_v46, %v2207_v34 }
 0x1a1   : > { %v1566_v8 = vadd.f32 %v2952_v37, %v1527_v33  ;;  %v1528_v9 = vmax.f32 %v1206_v3, %v1427_v32  ;;  %v3236_v32 = vmax.f32 %v2856_v59, %v2858_v60 }
 0x1a2   : > { %v1600_v20 = vmax.f32 %v1568_v35, 0.0  ;;  %v1569_v38 = vadd.f32 %v2952_v37, %v1530_v36  ;;  %v3237_v36 = vmax.f32 %v2862_v62, %v2864_v63 }
 0x1a3   : > { %v1598_v39 = vmax.f32 %v1566_v8, 0.0  ;;  %v1567_v21 = vadd.f32 %v2952_v37, %v1528_v9  ;;  %v2162_v19 = vpop.f32.mrb[44].mxu0  ;;  %v2210_v6 = vpop.f32.mrb[44].mxu1 }
 0x1a4   : > { %1632 = vst [vmem:[%s2968_s27 + $0x50] sm:$0xff] %v1600_v20  ;;  %v1601_v41 = vmax.f32 %v1569_v38, 0.0  ;;  %v1211_v23 = vmax.f32 %v3231_v42, %v2162_v19  ;;  %v1118_v24 = vpop.f32.mrb[45].mxu0  ;;  %v1440_v11 = vpop.f32.mrb[45].mxu1  ;;  %v3238_v20 = vmax.f32 %v2868_v1, %v2870_v2  ;;  %v3239_v2 = vmax.f32 %v2874_v4, %v2876_v5 }
 0x1a5   : > { %1630 = vst [vmem:[%s2968_s27 + $0x40] sm:$0xff] %v1598_v39  ;;  %v1599_v12 = vmax.f32 %v1567_v21, 0.0  ;;  %v1209_v26 = vmax.f32 %v3232_v16, %v1118_v24  ;;  %v2163_v27 = vpop.f32.mrb[46].mxu0  ;;  %v2211_v13 = vpop.f32.mrb[46].mxu1  ;;  %v3240_v16 = vmax.f32 %v2880_v7, %v2882_v61 }
 0x1a6   : > { %1633 = vst [vmem:[%s2968_s27 + $0x58] sm:$0xff] %v1601_v41  ;;  %v1533_v22 = vmax.f32 %v1211_v23, %v2210_v6  ;;  %v1212_v29 = vmax.f32 %v3233_v14, %v2163_v27  ;;  %v1121_v30 = vpop.f32.mrb[47].mxu0  ;;  %v1443_v44 = vpop.f32.mrb[47].mxu1  ;;  %v3241_v14 = vmax.f32 %v2886_v58, %v2888_v55 }
 0x1a7   : > { %1631 = vst [vmem:[%s2968_s27 + $0x48] sm:$0xff] %v1599_v12  ;;  %v1531_v45 = vmax.f32 %v1209_v26, %v1440_v11  ;;  %v1210_v15 = vmax.f32 %v3234_v10, %v1121_v30 }
 0x1a8   : > { %v1572_v47 = vadd.f32 %v2952_v37, %v1533_v22  ;;  %v1534_v48 = vmax.f32 %v1212_v29, %v2211_v13 }
 0x1a9   : > { %v1570_v17 = vadd.f32 %v2952_v37, %v1531_v45  ;;  %v1532_v18 = vmax.f32 %v1210_v15, %v1443_v44  ;;  %v3242_v44 = vld [vmem:[#allocation14_spill] sm:$0xff] }
 0x1aa   : > { %v1604_v25 = vmax.f32 %v1572_v47, 0.0  ;;  %v1573_v50 = vadd.f32 %v2952_v37, %v1534_v48  ;;  %v3243_v45 = vmax.f32 %v2892_v52, %v3242_v44 }
 0x1ab   : > { %v1602_v51 = vmax.f32 %v1570_v17, 0.0  ;;  %v1571_v28 = vadd.f32 %v2952_v37, %v1532_v18  ;;  %v2166_v31 = vpop.f32.mrb[48].mxu0  ;;  %v2214_v34 = vpop.f32.mrb[48].mxu1 }
 0x1ac   : > { %1636 = vst [vmem:[%s2968_s27 + $0x70] sm:$0xff] %v1604_v25  ;;  %v1605_v53 = vmax.f32 %v1573_v50, 0.0  ;;  %v1215_v40 = vmax.f32 %v3235_v54, %v2166_v31  ;;  %v1134_v43 = vpop.f32.mrb[49].mxu0  ;;  %v1456_v46 = vpop.f32.mrb[49].mxu1  ;;  %v3244_v50 = vld [vmem:[#allocation15_spill] sm:$0xff] }
 0x1ad   : > { %1634 = vst [vmem:[%s2968_s27 + $0x60] sm:$0xff] %v1602_v51  ;;  %v1603_v49 = vmax.f32 %v1571_v28, 0.0  ;;  %v1213_v33 = vmax.f32 %v3236_v32, %v1134_v43  ;;  %v2167_v0 = vpop.f32.mrb[50].mxu0  ;;  %v2215_v3 = vpop.f32.mrb[50].mxu1  ;;  %v3245_v51 = vld [vmem:[#allocation16_spill] sm:$0xff]  ;;  %v3248_v43 = vld [vmem:[#allocation18_spill] sm:$0xff] }
 0x1ae   : > { %1637 = vst [vmem:[%s2968_s27 + $0x78] sm:$0xff] %v1605_v53  ;;  %v1537_v35 = vmax.f32 %v1215_v40, %v2214_v34  ;;  %v1216_v8 = vmax.f32 %v3237_v36, %v2167_v0  ;;  %v1137_v9 = vpop.f32.mrb[51].mxu0  ;;  %v1459_v56 = vpop.f32.mrb[51].mxu1  ;;  %v3246_v28 = vmax.f32 %v3244_v50, %v3245_v51  ;;  %v3247_v40 = vld [vmem:[#allocation17_spill] sm:$0xff] }
 0x1af   : > { %1635 = vst [vmem:[%s2968_s27 + $0x68] sm:$0xff] %v1603_v49  ;;  %v1535_v57 = vmax.f32 %v1213_v33, %v1456_v46  ;;  %v1214_v38 = vmax.f32 %v3238_v20, %v1137_v9  ;;  %v3249_v46 = vmax.f32 %v3247_v40, %v3248_v43  ;;  %v3253_v20 = vld [vmem:[#allocation21_spill] sm:$0xff] }
 0x1b0   : > { %v1576_v59 = vadd.f32 %v2952_v37, %v1537_v35  ;;  %v1538_v60 = vmax.f32 %v1216_v8, %v2215_v3  ;;  %v3250_v3 = vld [vmem:[#allocation19_spill] sm:$0xff]  ;;  %v3251_v35 = vld [vmem:[#allocation20_spill] sm:$0xff] }
 0x1b1   : > { %v1574_v39 = vadd.f32 %v2952_v37, %v1535_v57  ;;  %v1536_v21 = vmax.f32 %v1214_v38, %v1459_v56  ;;  %v3252_v36 = vmax.f32 %v3250_v3, %v3251_v35  ;;  %v3254_v38 = vld [vmem:[#allocation22_spill] sm:$0xff] }
 0x1b2   : > { %v1608_v19 = vmax.f32 %v1576_v59, 0.0  ;;  %v1577_v62 = vadd.f32 %v2952_v37, %v1538_v60  ;;  %v3255_v59 = vmax.f32 %v3253_v20, %v3254_v38 }
 0x1b3   : > { %v1606_v63 = vmax.f32 %v1574_v39, 0.0  ;;  %v1575_v6 = vadd.f32 %v2952_v37, %v1536_v21  ;;  %v2170_v41 = vpop.f32.mrb[52].mxu0  ;;  %v2218_v42 = vpop.f32.mrb[52].mxu1 }
 0x1b4   : > { %1640 = vst [vmem:[%s2968_s27 + $0x90] sm:$0xff] %v1608_v19  ;;  %v1609_v1 = vmax.f32 %v1577_v62, 0.0  ;;  %v1219_v23 = vmax.f32 %v3239_v2, %v2170_v41  ;;  %v1150_v24 = vpop.f32.mrb[53].mxu0  ;;  %v1472_v11 = vpop.f32.mrb[53].mxu1 }
 0x1b5   : > { %1638 = vst [vmem:[%s2968_s27 + $0x80] sm:$0xff] %v1606_v63  ;;  %v1607_v12 = vmax.f32 %v1575_v6, 0.0  ;;  %v1217_v26 = vmax.f32 %v3240_v16, %v1150_v24  ;;  %v2171_v27 = vpop.f32.mrb[54].mxu0  ;;  %v2219_v13 = vpop.f32.mrb[54].mxu1  ;;  %v3256_v24 = vld [vmem:[#allocation23_spill] sm:$0xff] }
 0x1b6   : > { %1641 = vst [vmem:[%s2968_s27 + $0x98] sm:$0xff] %v1609_v1  ;;  %v1541_v22 = vmax.f32 %v1219_v23, %v2218_v42  ;;  %v1220_v29 = vmax.f32 %v3241_v14, %v2171_v27  ;;  %v1153_v30 = vpop.f32.mrb[55].mxu0  ;;  %v1475_v4 = vpop.f32.mrb[55].mxu1  ;;  %v3260_v14 = vld [vmem:[#allocation26_spill] sm:$0xff] }
 0x1b7   : > { %1639 = vst [vmem:[%s2968_s27 + $0x88] sm:$0xff] %v1607_v12  ;;  %v1539_v5 = vmax.f32 %v1217_v26, %v1472_v11  ;;  %v1218_v10 = vmax.f32 %v3243_v45, %v1153_v30  ;;  %v3257_v11 = vld [vmem:[#allocation24_spill] sm:$0xff]  ;;  %v3262_v45 = vld [vmem:[#allocation27_spill] sm:$0xff] }
 0x1b8   : > { %v1580_v61 = vadd.f32 %v2952_v37, %v1541_v22  ;;  %v1542_v7 = vmax.f32 %v1220_v29, %v2219_v13  ;;  %v3258_v12 = vmax.f32 %v3256_v24, %v3257_v11  ;;  %v3259_v22 = vld [vmem:[#allocation25_spill] sm:$0xff] }
 0x1b9   : > { %v1578_v15 = vadd.f32 %v2952_v37, %v1539_v5  ;;  %v1540_v47 = vmax.f32 %v1218_v10, %v1475_v4  ;;  %v3261_v29 = vmax.f32 %v3259_v22, %v3260_v14  ;;  %v3263_v10 = vld [vmem:[#allocation28_spill] sm:$0xff] }
 0x1ba   : > { %v1612_v48 = vmax.f32 %v1580_v61, 0.0  ;;  %v1581_v55 = vadd.f32 %v2952_v37, %v1542_v7  ;;  %v3264_v61 = vmax.f32 %v3262_v45, %v3263_v10 }
 0x1bb   : > { %v1610_v58 = vmax.f32 %v1578_v15, 0.0  ;;  %v1579_v17 = vadd.f32 %v2952_v37, %v1540_v47  ;;  %v2174_v18 = vpop.f32.mrb[56].mxu0  ;;  %v2222_v25 = vpop.f32.mrb[56].mxu1 }
 0x1bc   : > { %1644 = vst [vmem:[%s2968_s27 + $0xb0] sm:$0xff] %v1612_v48  ;;  %v1613_v52 = vmax.f32 %v1581_v55, 0.0  ;;  %v1223_v31 = vmax.f32 %v3246_v28, %v2174_v18  ;;  %v1166_v34 = vpop.f32.mrb[57].mxu0  ;;  %v1488_v53 = vpop.f32.mrb[57].mxu1  ;;  %v3265_v55 = vld [vmem:[#allocation29_spill] sm:$0xff] }
 0x1bd   : > { %1642 = vst [vmem:[%s2968_s27 + $0xa0] sm:$0xff] %v1610_v58  ;;  %v1611_v54 = vmax.f32 %v1579_v17, 0.0  ;;  %v1221_v49 = vmax.f32 %v3249_v46, %v1166_v34  ;;  %v2175_v32 = vpop.f32.mrb[58].mxu0  ;;  %v2223_v33 = vpop.f32.mrb[58].mxu1  ;;  %v3266_v58 = vld [vmem:[#allocation30_spill] sm:$0xff] }
 0x1be   : > { %1645 = vst [vmem:[%s2968_s27 + $0xb8] sm:$0xff] %v1613_v52  ;;  %v1545_v0 = vmax.f32 %v1223_v31, %v2222_v25  ;;  %v1224_v8 = vmax.f32 %v3252_v36, %v2175_v32  ;;  %v1169_v9 = vpop.f32.mrb[59].mxu0  ;;  %v1491_v56 = vpop.f32.mrb[59].mxu1  ;;  %v3267_v17 = vmax.f32 %v3265_v55, %v3266_v58 }
 0x1bf   : > { %1643 = vst [vmem:[%s2968_s27 + $0xa8] sm:$0xff] %v1611_v54  ;;  %v1543_v57 = vmax.f32 %v1221_v49, %v1488_v53  ;;  %v1222_v60 = vmax.f32 %v3255_v59, %v1169_v9 }
 0x1c0   : > { %v1584_v39 = vadd.f32 %v2952_v37, %v1545_v0  ;;  %v1546_v21 = vmax.f32 %v1224_v8, %v2223_v33 }
 0x1c1   : > { %v1582_v19 = vadd.f32 %v2952_v37, %v1543_v57  ;;  %v1544_v62 = vmax.f32 %v1222_v60, %v1491_v56 }
 0x1c2   : > { %v1616_v63 = vmax.f32 %v1584_v39, 0.0  ;;  %v1585_v6 = vadd.f32 %v2952_v37, %v1546_v21 }
 0x1c3   : > { %v1614_v41 = vmax.f32 %v1582_v19, 0.0  ;;  %v1583_v42 = vadd.f32 %v2952_v37, %v1544_v62  ;;  %v2178_v1 = vpop.f32.mrb[60].mxu0  ;;  %v2226_v2 = vpop.f32.mrb[60].mxu1 }
 0x1c4   : > { %1648 = vst [vmem:[%s2968_s27 + $0xd0] sm:$0xff] %v1616_v63  ;;  %v1617_v23 = vmax.f32 %v1585_v6, 0.0  ;;  %v1227_v16 = vmax.f32 %v3258_v12, %v2178_v1  ;;  %v1182_v26 = vpop.f32.mrb[61].mxu0  ;;  %v1504_v27 = vpop.f32.mrb[61].mxu1 }
 0x1c5   : > { %1646 = vst [vmem:[%s2968_s27 + $0xc0] sm:$0xff] %v1614_v41  ;;  %v1615_v13 = vmax.f32 %v1583_v42, 0.0  ;;  %v1225_v30 = vmax.f32 %v3261_v29, %v1182_v26  ;;  %v2179_v4 = vpop.f32.mrb[62].mxu0  ;;  %v2227_v5 = vpop.f32.mrb[62].mxu1 }
 0x1c6   : > { %1649 = vst [vmem:[%s2968_s27 + $0xd8] sm:$0xff] %v1617_v23  ;;  %v1549_v44 = vmax.f32 %v1227_v16, %v2226_v2  ;;  %v1228_v7 = vmax.f32 %v3264_v61, %v2179_v4  ;;  %v1185_v15 = vpop.f32.mrb[63].mxu0  ;;  %v1507_v47 = vpop.f32.mrb[63].mxu1 }
 0x1c7   : > { %1647 = vst [vmem:[%s2968_s27 + $0xc8] sm:$0xff] %v1615_v13  ;;  %v1547_v48 = vmax.f32 %v1225_v30, %v1504_v27  ;;  %v1226_v18 = vmax.f32 %v3267_v17, %v1185_v15 }
 0x1c8   : > { %v1588_v25 = vadd.f32 %v2952_v37, %v1549_v44  ;;  %v1550_v52 = vmax.f32 %v1228_v7, %v2227_v5 }
 0x1c9   : > { %v1586_v50 = vadd.f32 %v2952_v37, %v1547_v48  ;;  %v1548_v51 = vmax.f32 %v1226_v18, %v1507_v47 }
 0x1ca   : > { %v1620_v28 = vmax.f32 %v1588_v25, 0.0  ;;  %v1589_v31 = vadd.f32 %v2952_v37, %v1550_v52 }
 0x1cb   : > { %v1618_v34 = vmax.f32 %v1586_v50, 0.0  ;;  %v1587_v53 = vadd.f32 %v2952_v37, %v1548_v51 }
 0x1cc   : > { %1652 = vst [vmem:[%s2968_s27 + $0xf0] sm:$0xff] %v1620_v28  ;;  %v1621_v54 = vmax.f32 %v1589_v31, 0.0 }
 0x1cd   : > { %1650 = vst [vmem:[%s2968_s27 + $0xe0] sm:$0xff] %v1618_v34  ;;  %v1619_v40 = vmax.f32 %v1587_v53, 0.0 }
 0x1ce   : > { %1653 = vst [vmem:[%s2968_s27 + $0xf8] sm:$0xff] %v1621_v54 }
 0x1cf   : > { %1651 = vst [vmem:[%s2968_s27 + $0xe8] sm:$0xff] %v1619_v40 }
 0x1d0   : > { %2410 = shalt.err (!%p2407_p1)
}
 0x1d1   : > { %s2411_s5 = scalar_lea.hbm %s3116_s19, 4096  ;;  %s2415_s10 = scalar_lea.hbm %s3168_s3, 8192 }
 0x1d2   : > { %p2412_p4 = scmp.ne.s32.totalorder %s3116_s19, %s2411_s5  ;;  %p2416_p11 = scmp.lt.u32.totalorder %s3116_s19, %s3168_s3 }
 0x1d3   : > { %p2417_p12 = scmp.lt.u32.totalorder %s2415_s10, %s2411_s5  ;;  %p2419_p3 = scmp.lt.u32.totalorder %s2411_s5, %s3116_s19 }
 0x1d4   : > { %p2413_p5 = pnand %p2412_p4, %p3268_p2 }
 0x1d5   : > { %p2418_p13 = por %p2417_p12, %p2416_p11 }
 0x1d6   : > { %p2414_p6 = pneg %p2413_p5 }
 0x1d7   : > { %p2420_p7 = por %p2419_p3, %p2418_p13 }
 0x1d9   : > { %p2421_p8 = pnand %p2420_p7, %p2414_p6 }
 0x1db   : > { %2424 = shalt.err (!%p2421_p8)
}
 0x1dc   : > { %s2479_s26 = smov 128   ;;  %s2480_s27 = smov 8  }
 0x1dd   : > { %2241 = dma.vmem_to_hbm [thread:$0]  (%p3268_p2), %s3118_s8, 4096, %s3116_s19, %s1655_s16, %s2479_s26, %s2479_s26, %s2480_s27  }
 0x1de PF: > { %s1683_s28 = sand.u32 1, %s2455_s12   ;;  %p3269_p9 = scmp.ne.s32.totalorder %s3194_s25, 0 }
 0x1df   : > { %s1684_s11 = scalar_lea.sflag [#allocation4], %s1683_s28 }
 0x1e0   : > { %p2248_p10 = pnand %p1754_p0, %p3269_p9 }
 0x1e2   : > { %2450 = dma.done.wait (!%p2248_p10), %s1684_s11, 4096  }
 0x1e3   : > { %2452 = vsyncadd (!%p2248_p10), %s1684_s11, 4294963200  ;;  %p17_p1 = scmp.ge.s32.totalorder %s2526_s18, 4   ;;  %s3270_s12 = smov %s2459_s13 }
 0x1e4   : > { %s3271_s13 = smov %s2463_s14  ;;  %s3272_s14 = smov %s2538_s21 }
 0x1e5   : > { %s3273_s15 = smov %s2526_s18  ;;  %19 = sbr.rel (!%p17_p1) target bundleno = 6 (0x6), region = 89 }
 0x1ec   :  { %1689 = vsyncpa [#allocation3], 1 }
 0x1ed   :  { %1691 = vsyncpa [#allocation3 + $0x1], 1 }
 0x1ee   :  { %1692 = vsyncpa [#allocation6], 1 }
 0x1ef   :  { %1693 = vsyncpa [#allocation4], 1 }
 0x1f0   :  { %1695 = vsyncpa [#allocation4 + $0x1], 1 }

</bundles_post_ra>
